<compile_context>
chip_gen: v6e
topology: v6e:2x2x1
jax: 0.10.0
libtpu: 0.0.40
codegen_flags: <defaults>
</compile_context>

<pallas_src>
import functools

import jax
import jax.numpy as jnp
from jax.experimental import pallas as pl


def _lstm_recurrence_kernel(pre_ref, h0_ref, c0_ref, w_hh_ref,
                            states_ref, cT_ref,
                            *, seq_len, batch_pad, hidden_size):
    """Single-invocation LSTM recurrence (no grid; everything VMEM-resident).

    Shapes (batch already padded to Bp = 8 sublanes):
      pre_ref    : (T*Bp, 4H) f32   x@W_ih + b, i/f/o gate columns scaled by 0.5
      h0_ref     : (Bp, H)    f32
      c0_ref     : (Bp, H)    f32
      w_hh_ref   : (H, 4H)    bf16  recurrent weights (i/f/o columns scaled 0.5)
      states_ref : (Bp, T*H)  f32   h_t stored in columns [t*H:(t+1)*H]  (lane-dense)
      cT_ref     : (Bp, H)    f32   final cell state
    """
    T, Bp, H = seq_len, batch_pad, hidden_size

    w_hh = w_hh_ref[...]                     # (H, 4H) bf16, loaded once
    h = h0_ref[...]                          # (Bp, H) f32
    c = c0_ref[...]                          # (Bp, H) f32

    hs = []
    for t in range(T):                       # fully unrolled; T is small & static
        # Serial-path work per step: one small bf16 MXU matmul (f32 accumulate)
        # plus VPU/EUP gate math.  pre_ref slice is a dense (8, 128) vreg.
        gates = pre_ref[t * Bp:(t + 1) * Bp, :] + jnp.dot(
            h.astype(jnp.bfloat16), w_hh,
            preferred_element_type=jnp.float32)            # (Bp, 4H) f32
        # One full-tile tanh; sigmoids recovered as 0.5*t + 0.5 because the
        # i/f/o pre-activations were pre-scaled by 0.5 in the wrapper.
        tg = jnp.tanh(gates)
        i_g = 0.5 * tg[:, 0 * H:1 * H] + 0.5
        f_g = 0.5 * tg[:, 1 * H:2 * H] + 0.5
        g_g = tg[:, 2 * H:3 * H]
        o_g = 0.5 * tg[:, 3 * H:4 * H] + 0.5
        c = f_g * c + i_g * g_g
        h = o_g * jnp.tanh(c)
        hs.append(h)

    # Epilogue: all hidden-state stores happen after the loop, off the serial
    # chain; the HBM writeback of states_ref is one lane-dense (8, 256) DMA.
    for t in range(T):
        states_ref[:, t * H:(t + 1) * H] = hs[t].astype(states_ref.dtype)
    cT_ref[...] = c.astype(cT_ref.dtype)     # written exactly once


def lstm_model_climate_forward(x, h0, c0, params):
    """x: [B, T, F]; h0/c0: [num_layers=1, B, H]; params: pre-transposed weights.

    Returns (sequence_of_states [B,T,H], output_sequence [B,T,O], (hT, cT))
    matching LSTMModelClimate.forward.
    """
    B, T, F = x.shape
    H = params["w_hh"].shape[0]              # w_hh stored as [H, 4H]
    hp = jax.lax.Precision.HIGHEST

    # Pad batch to 8 sublanes so every in-kernel row is vreg-dense.
    Bp = max(8, ((B + 7) // 8) * 8)
    pad_b = Bp - B

    x_tm = jnp.transpose(x, (1, 0, 2))                       # [T, B, F]
    x_tm = jnp.pad(x_tm, ((0, 0), (0, pad_b), (0, 0)))       # [T, Bp, F]
    x2d = x_tm.reshape(T * Bp, F)                            # row = t*Bp + b

    h0p = jnp.pad(h0[0], ((0, pad_b), (0, 0)))               # [Bp, H]
    c0p = jnp.pad(c0[0], ((0, pad_b), (0, 0)))               # [Bp, H]

    # sigmoid(z) = 0.5*tanh(z/2) + 0.5  =>  pre-scale the i/f/o gate columns of
    # the weights/bias by 0.5 (exact power-of-two scaling, trace-time) so the
    # kernel needs a single full-tile tanh per step.
    gate_scale = jnp.concatenate(
        [jnp.full((1, H), 0.5, jnp.float32),
         jnp.full((1, H), 0.5, jnp.float32),
         jnp.ones((1, H), jnp.float32),
         jnp.full((1, H), 0.5, jnp.float32)], axis=1)        # (1, 4H)
    w_ih_s = params["w_ih"] * gate_scale                     # (F, 4H)
    w_hh_s = params["w_hh"] * gate_scale                     # (H, 4H)
    bias_s = (params["b_ih"] + params["b_hh"]).reshape(1, 4 * H) * gate_scale

    # Phase 1 (time-parallel) hoisted out of the kernel: one XLA matmul
    # producing the lane-dense (T*Bp, 4H) pre-gates tensor.
    pre_gates = jnp.dot(x2d, w_ih_s, precision=hp) + bias_s  # (T*Bp, 4H) f32

    # Recurrent weights go down the MXU-native bf16 path (f32 accumulation in
    # the kernel); the 0.5 scaling is exact in bf16 as well.
    w_hh_bf16 = w_hh_s.astype(jnp.bfloat16)

    kernel = functools.partial(_lstm_recurrence_kernel,
                               seq_len=T, batch_pad=Bp, hidden_size=H)

    cost = pl.CostEstimate(
        flops=2 * T * Bp * H * 4 * H + 12 * T * Bp * H,
        transcendentals=T * Bp * (4 * H + H),
        bytes_accessed=(T * Bp * 4 * H * 4 + 2 * Bp * H * 4 + H * 4 * H * 2
                        + Bp * T * H * 4 + Bp * H * 4),
    )

    # No grid / BlockSpecs: the whole working set (tens of KiB) is VMEM-resident
    # and the T-step recurrence runs in one invocation.
    states2d, cT_p = pl.pallas_call(
        kernel,
        out_shape=(
            jax.ShapeDtypeStruct((Bp, T * H), jnp.float32),  # all h_t, lane-dense
            jax.ShapeDtypeStruct((Bp, H), jnp.float32),      # c_T
        ),
        cost_estimate=cost,
    )(pre_gates, h0p, c0p, w_hh_bf16)

    # (Bp, T*H) -> (B, T, H): cheap reshape + slice, no transpose needed.
    sequence_of_states = states2d.reshape(Bp, T, H)[:B]

    # Output projection is pointwise over time -> one batched XLA matmul, off
    # the recurrent critical path.
    output_sequence = (jnp.einsum("bth,ho->bto", sequence_of_states,
                                  params["w_out"], precision=hp)
                       + params["b_out"])

    hT = sequence_of_states[:, -1, :][None]                  # == h_T (1 layer)
    cT = cT_p[:B][None]                                      # [1, B, H]
    return sequence_of_states, output_sequence, (hT, cT)


def _reference_forward(x, h0, c0, params):
    """Pure-JAX reference (same math as torch.nn.LSTM + nn.Linear, full f32)."""
    H = params["w_hh"].shape[0]
    bias = params["b_ih"] + params["b_hh"]
    hp = jax.lax.Precision.HIGHEST

    def step(carry, x_t):
        h, c = carry
        gates = (jnp.dot(x_t, params["w_ih"], precision=hp)
                 + jnp.dot(h, params["w_hh"], precision=hp) + bias)
        i = jax.nn.sigmoid(gates[:, 0 * H:1 * H])
        f = jax.nn.sigmoid(gates[:, 1 * H:2 * H])
        g = jnp.tanh(gates[:, 2 * H:3 * H])
        o = jax.nn.sigmoid(gates[:, 3 * H:4 * H])
        c_new = f * c + i * g
        h_new = o * jnp.tanh(c_new)
        return (h_new, c_new), h_new

    (hT, cT), states_tm = jax.lax.scan(step, (h0[0], c0[0]),
                                       jnp.transpose(x, (1, 0, 2)))
    states = jnp.transpose(states_tm, (1, 0, 2))
    out = jnp.einsum("bth,ho->bto", states, params["w_out"],
                     precision=hp) + params["b_out"]
    return states, out, (hT[None], cT[None])


def _init_params(key, input_size, hidden_size, output_size):
    """Deterministic init matching nn.LSTM / nn.Linear param shapes.

    Weights are stored pre-transposed for right-multiplication in the kernel.
    """
    k = 1.0 / jnp.sqrt(hidden_size)
    keys = jax.random.split(key, 6)
    u = lambda kk, shape: jax.random.uniform(kk, shape, jnp.float32, -k, k)
    return {
        "w_ih": u(keys[0], (input_size, 4 * hidden_size)),   # = weight_ih_l0.T
        "w_hh": u(keys[1], (hidden_size, 4 * hidden_size)),  # = weight_hh_l0.T
        "b_ih": u(keys[2], (4 * hidden_size,)),
        "b_hh": u(keys[3], (4 * hidden_size,)),
        "w_out": u(keys[4], (hidden_size, output_size)),     # = linear.weight.T
        "b_out": u(keys[5], (output_size,)),
    }


if __name__ == "__main__":
    batch, window, input_size = 2, 8, 4
    hidden_size, output_size = 32, 4
    num_layers = 1

    root = jax.random.PRNGKey(0)
    k_x, k_h0, k_c0, k_p = jax.random.split(root, 4)

    x = jax.random.normal(k_x, (batch, window, input_size), jnp.float32)
    # s0_nature == 'random_': uniform(-0.75, 0.75)  (train_s0 only affects grads)
    h0 = jax.random.uniform(k_h0, (num_layers, batch, hidden_size), jnp.float32,
                            -0.75, 0.75)
    c0 = jax.random.uniform(k_c0, (num_layers, batch, hidden_size), jnp.float32,
                            -0.75, 0.75)
    params = _init_params(k_p, input_size, hidden_size, output_size)

    fwd = jax.jit(lstm_model_climate_forward)
    states, outputs, (hT, cT) = jax.block_until_ready(fwd(x, h0, c0, params))

    # Correctness check against the full-f32 pure-JAX reference.  Tolerance
    # accounts for the bf16-operand (f32-accumulate) recurrent matmul and the
    # sigmoid-via-tanh identity; real bugs show up as O(0.1+) errors.
    r_states, r_outputs, (r_hT, r_cT) = _reference_forward(x, h0, c0, params)
    tol = dict(atol=1e-2, rtol=1e-2)
    assert jnp.allclose(states, r_states, **tol)
    assert jnp.allclose(outputs, r_outputs, **tol)
    assert jnp.allclose(hT, r_hT, **tol)
    assert jnp.allclose(cT, r_cT, **tol)

    print("KERNEL_OK")
</pallas_src>

<mosaic_0001>
module attributes {stable_mosaic.version = 11 : i64} {
  func.func @_lstm_recurrence_kernel(%arg0: memref<64x128xf32, #tpu.memory_space<vmem>>, %arg1: memref<8x32xf32, #tpu.memory_space<vmem>>, %arg2: memref<8x32xf32, #tpu.memory_space<vmem>>, %arg3: memref<32x128xbf16, #tpu.memory_space<vmem>>, %arg4: memref<8x256xf32, #tpu.memory_space<vmem>>, %arg5: memref<8x32xf32, #tpu.memory_space<vmem>>) attributes {dimension_semantics = [], scalar_prefetch = 0 : i64, scratch_operands = 0 : i64, tpu.core_type = #tpu.core_type<tc>} {
    %c0 = arith.constant 0 : index
    %c0_0 = arith.constant 0 : index
    %0 = vector.load %arg3[%c0, %c0_0] : memref<32x128xbf16, #tpu.memory_space<vmem>>, vector<32x128xbf16>
    %c0_1 = arith.constant 0 : index
    %c0_2 = arith.constant 0 : index
    %1 = vector.load %arg1[%c0_1, %c0_2] : memref<8x32xf32, #tpu.memory_space<vmem>>, vector<8x32xf32>
    %c0_3 = arith.constant 0 : index
    %c0_4 = arith.constant 0 : index
    %2 = vector.load %arg2[%c0_3, %c0_4] : memref<8x32xf32, #tpu.memory_space<vmem>>, vector<8x32xf32>
    %c0_5 = arith.constant 0 : index
    %c0_6 = arith.constant 0 : index
    %3 = vector.load %arg0[%c0_5, %c0_6] : memref<64x128xf32, #tpu.memory_space<vmem>>, vector<8x128xf32>
    %4 = arith.truncf %1 : vector<8x32xf32> to vector<8x32xbf16>
    %cst = arith.constant dense<0.000000e+00> : vector<8x128xf32>
    %5 = tpu.matmul %4, %0, %cst {dimension_numbers = #tpu.dot_dimension_numbers<[1], [0], [0], [1], [0, 0, 1, 1], [], []>} : vector<8x32xbf16>, vector<32x128xbf16>, vector<8x128xf32> -> vector<8x128xf32>
    %6 = arith.addf %3, %5 : vector<8x128xf32>
    %7 = math.tanh %6 : vector<8x128xf32>
    %8 = vector.extract_strided_slice %7 {offsets = [0, 0], sizes = [8, 32], strides = [1, 1]} : vector<8x128xf32> to vector<8x32xf32>
    %cst_7 = arith.constant 5.000000e-01 : f32
    %9 = vector.broadcast %cst_7 : f32 to vector<8x32xf32>
    %10 = arith.mulf %9, %8 : vector<8x32xf32>
    %cst_8 = arith.constant 5.000000e-01 : f32
    %11 = vector.broadcast %cst_8 : f32 to vector<8x32xf32>
    %12 = arith.addf %10, %11 : vector<8x32xf32>
    %13 = vector.extract_strided_slice %7 {offsets = [0, 32], sizes = [8, 32], strides = [1, 1]} : vector<8x128xf32> to vector<8x32xf32>
    %cst_9 = arith.constant 5.000000e-01 : f32
    %14 = vector.broadcast %cst_9 : f32 to vector<8x32xf32>
    %15 = arith.mulf %14, %13 : vector<8x32xf32>
    %cst_10 = arith.constant 5.000000e-01 : f32
    %16 = vector.broadcast %cst_10 : f32 to vector<8x32xf32>
    %17 = arith.addf %15, %16 : vector<8x32xf32>
    %18 = vector.extract_strided_slice %7 {offsets = [0, 64], sizes = [8, 32], strides = [1, 1]} : vector<8x128xf32> to vector<8x32xf32>
    %19 = vector.extract_strided_slice %7 {offsets = [0, 96], sizes = [8, 32], strides = [1, 1]} : vector<8x128xf32> to vector<8x32xf32>
    %cst_11 = arith.constant 5.000000e-01 : f32
    %20 = vector.broadcast %cst_11 : f32 to vector<8x32xf32>
    %21 = arith.mulf %20, %19 : vector<8x32xf32>
    %cst_12 = arith.constant 5.000000e-01 : f32
    %22 = vector.broadcast %cst_12 : f32 to vector<8x32xf32>
    %23 = arith.addf %21, %22 : vector<8x32xf32>
    %24 = arith.mulf %17, %2 : vector<8x32xf32>
    %25 = arith.mulf %12, %18 : vector<8x32xf32>
    %26 = arith.addf %24, %25 : vector<8x32xf32>
    %27 = math.tanh %26 : vector<8x32xf32>
    %28 = arith.mulf %23, %27 : vector<8x32xf32>
    %c8 = arith.constant 8 : index
    %c0_13 = arith.constant 0 : index
    %29 = vector.load %arg0[%c8, %c0_13] : memref<64x128xf32, #tpu.memory_space<vmem>>, vector<8x128xf32>
    %30 = arith.truncf %28 : vector<8x32xf32> to vector<8x32xbf16>
    %cst_14 = arith.constant dense<0.000000e+00> : vector<8x128xf32>
    %31 = tpu.matmul %30, %0, %cst_14 {dimension_numbers = #tpu.dot_dimension_numbers<[1], [0], [0], [1], [0, 0, 1, 1], [], []>} : vector<8x32xbf16>, vector<32x128xbf16>, vector<8x128xf32> -> vector<8x128xf32>
    %32 = arith.addf %29, %31 : vector<8x128xf32>
    %33 = math.tanh %32 : vector<8x128xf32>
    %34 = vector.extract_strided_slice %33 {offsets = [0, 0], sizes = [8, 32], strides = [1, 1]} : vector<8x128xf32> to vector<8x32xf32>
    %cst_15 = arith.constant 5.000000e-01 : f32
    %35 = vector.broadcast %cst_15 : f32 to vector<8x32xf32>
    %36 = arith.mulf %35, %34 : vector<8x32xf32>
    %cst_16 = arith.constant 5.000000e-01 : f32
    %37 = vector.broadcast %cst_16 : f32 to vector<8x32xf32>
    %38 = arith.addf %36, %37 : vector<8x32xf32>
    %39 = vector.extract_strided_slice %33 {offsets = [0, 32], sizes = [8, 32], strides = [1, 1]} : vector<8x128xf32> to vector<8x32xf32>
    %cst_17 = arith.constant 5.000000e-01 : f32
    %40 = vector.broadcast %cst_17 : f32 to vector<8x32xf32>
    %41 = arith.mulf %40, %39 : vector<8x32xf32>
    %cst_18 = arith.constant 5.000000e-01 : f32
    %42 = vector.broadcast %cst_18 : f32 to vector<8x32xf32>
    %43 = arith.addf %41, %42 : vector<8x32xf32>
    %44 = vector.extract_strided_slice %33 {offsets = [0, 64], sizes = [8, 32], strides = [1, 1]} : vector<8x128xf32> to vector<8x32xf32>
    %45 = vector.extract_strided_slice %33 {offsets = [0, 96], sizes = [8, 32], strides = [1, 1]} : vector<8x128xf32> to vector<8x32xf32>
    %cst_19 = arith.constant 5.000000e-01 : f32
    %46 = vector.broadcast %cst_19 : f32 to vector<8x32xf32>
    %47 = arith.mulf %46, %45 : vector<8x32xf32>
    %cst_20 = arith.constant 5.000000e-01 : f32
    %48 = vector.broadcast %cst_20 : f32 to vector<8x32xf32>
    %49 = arith.addf %47, %48 : vector<8x32xf32>
    %50 = arith.mulf %43, %26 : vector<8x32xf32>
    %51 = arith.mulf %38, %44 : vector<8x32xf32>
    %52 = arith.addf %50, %51 : vector<8x32xf32>
    %53 = math.tanh %52 : vector<8x32xf32>
    %54 = arith.mulf %49, %53 : vector<8x32xf32>
    %c16 = arith.constant 16 : index
    %c0_21 = arith.constant 0 : index
    %55 = vector.load %arg0[%c16, %c0_21] : memref<64x128xf32, #tpu.memory_space<vmem>>, vector<8x128xf32>
    %56 = arith.truncf %54 : vector<8x32xf32> to vector<8x32xbf16>
    %cst_22 = arith.constant dense<0.000000e+00> : vector<8x128xf32>
    %57 = tpu.matmul %56, %0, %cst_22 {dimension_numbers = #tpu.dot_dimension_numbers<[1], [0], [0], [1], [0, 0, 1, 1], [], []>} : vector<8x32xbf16>, vector<32x128xbf16>, vector<8x128xf32> -> vector<8x128xf32>
    %58 = arith.addf %55, %57 : vector<8x128xf32>
    %59 = math.tanh %58 : vector<8x128xf32>
    %60 = vector.extract_strided_slice %59 {offsets = [0, 0], sizes = [8, 32], strides = [1, 1]} : vector<8x128xf32> to vector<8x32xf32>
    %cst_23 = arith.constant 5.000000e-01 : f32
    %61 = vector.broadcast %cst_23 : f32 to vector<8x32xf32>
    %62 = arith.mulf %61, %60 : vector<8x32xf32>
    %cst_24 = arith.constant 5.000000e-01 : f32
    %63 = vector.broadcast %cst_24 : f32 to vector<8x32xf32>
    %64 = arith.addf %62, %63 : vector<8x32xf32>
    %65 = vector.extract_strided_slice %59 {offsets = [0, 32], sizes = [8, 32], strides = [1, 1]} : vector<8x128xf32> to vector<8x32xf32>
    %cst_25 = arith.constant 5.000000e-01 : f32
    %66 = vector.broadcast %cst_25 : f32 to vector<8x32xf32>
    %67 = arith.mulf %66, %65 : vector<8x32xf32>
    %cst_26 = arith.constant 5.000000e-01 : f32
    %68 = vector.broadcast %cst_26 : f32 to vector<8x32xf32>
    %69 = arith.addf %67, %68 : vector<8x32xf32>
    %70 = vector.extract_strided_slice %59 {offsets = [0, 64], sizes = [8, 32], strides = [1, 1]} : vector<8x128xf32> to vector<8x32xf32>
    %71 = vector.extract_strided_slice %59 {offsets = [0, 96], sizes = [8, 32], strides = [1, 1]} : vector<8x128xf32> to vector<8x32xf32>
    %cst_27 = arith.constant 5.000000e-01 : f32
    %72 = vector.broadcast %cst_27 : f32 to vector<8x32xf32>
    %73 = arith.mulf %72, %71 : vector<8x32xf32>
    %cst_28 = arith.constant 5.000000e-01 : f32
    %74 = vector.broadcast %cst_28 : f32 to vector<8x32xf32>
    %75 = arith.addf %73, %74 : vector<8x32xf32>
    %76 = arith.mulf %69, %52 : vector<8x32xf32>
    %77 = arith.mulf %64, %70 : vector<8x32xf32>
    %78 = arith.addf %76, %77 : vector<8x32xf32>
    %79 = math.tanh %78 : vector<8x32xf32>
    %80 = arith.mulf %75, %79 : vector<8x32xf32>
    %c24 = arith.constant 24 : index
    %c0_29 = arith.constant 0 : index
    %81 = vector.load %arg0[%c24, %c0_29] : memref<64x128xf32, #tpu.memory_space<vmem>>, vector<8x128xf32>
    %82 = arith.truncf %80 : vector<8x32xf32> to vector<8x32xbf16>
    %cst_30 = arith.constant dense<0.000000e+00> : vector<8x128xf32>
    %83 = tpu.matmul %82, %0, %cst_30 {dimension_numbers = #tpu.dot_dimension_numbers<[1], [0], [0], [1], [0, 0, 1, 1], [], []>} : vector<8x32xbf16>, vector<32x128xbf16>, vector<8x128xf32> -> vector<8x128xf32>
    %84 = arith.addf %81, %83 : vector<8x128xf32>
    %85 = math.tanh %84 : vector<8x128xf32>
    %86 = vector.extract_strided_slice %85 {offsets = [0, 0], sizes = [8, 32], strides = [1, 1]} : vector<8x128xf32> to vector<8x32xf32>
    %cst_31 = arith.constant 5.000000e-01 : f32
    %87 = vector.broadcast %cst_31 : f32 to vector<8x32xf32>
    %88 = arith.mulf %87, %86 : vector<8x32xf32>
    %cst_32 = arith.constant 5.000000e-01 : f32
    %89 = vector.broadcast %cst_32 : f32 to vector<8x32xf32>
    %90 = arith.addf %88, %89 : vector<8x32xf32>
    %91 = vector.extract_strided_slice %85 {offsets = [0, 32], sizes = [8, 32], strides = [1, 1]} : vector<8x128xf32> to vector<8x32xf32>
    %cst_33 = arith.constant 5.000000e-01 : f32
    %92 = vector.broadcast %cst_33 : f32 to vector<8x32xf32>
    %93 = arith.mulf %92, %91 : vector<8x32xf32>
    %cst_34 = arith.constant 5.000000e-01 : f32
    %94 = vector.broadcast %cst_34 : f32 to vector<8x32xf32>
    %95 = arith.addf %93, %94 : vector<8x32xf32>
    %96 = vector.extract_strided_slice %85 {offsets = [0, 64], sizes = [8, 32], strides = [1, 1]} : vector<8x128xf32> to vector<8x32xf32>
    %97 = vector.extract_strided_slice %85 {offsets = [0, 96], sizes = [8, 32], strides = [1, 1]} : vector<8x128xf32> to vector<8x32xf32>
    %cst_35 = arith.constant 5.000000e-01 : f32
    %98 = vector.broadcast %cst_35 : f32 to vector<8x32xf32>
    %99 = arith.mulf %98, %97 : vector<8x32xf32>
    %cst_36 = arith.constant 5.000000e-01 : f32
    %100 = vector.broadcast %cst_36 : f32 to vector<8x32xf32>
    %101 = arith.addf %99, %100 : vector<8x32xf32>
    %102 = arith.mulf %95, %78 : vector<8x32xf32>
    %103 = arith.mulf %90, %96 : vector<8x32xf32>
    %104 = arith.addf %102, %103 : vector<8x32xf32>
    %105 = math.tanh %104 : vector<8x32xf32>
    %106 = arith.mulf %101, %105 : vector<8x32xf32>
    %c32 = arith.constant 32 : index
    %c0_37 = arith.constant 0 : index
    %107 = vector.load %arg0[%c32, %c0_37] : memref<64x128xf32, #tpu.memory_space<vmem>>, vector<8x128xf32>
    %108 = arith.truncf %106 : vector<8x32xf32> to vector<8x32xbf16>
    %cst_38 = arith.constant dense<0.000000e+00> : vector<8x128xf32>
    %109 = tpu.matmul %108, %0, %cst_38 {dimension_numbers = #tpu.dot_dimension_numbers<[1], [0], [0], [1], [0, 0, 1, 1], [], []>} : vector<8x32xbf16>, vector<32x128xbf16>, vector<8x128xf32> -> vector<8x128xf32>
    %110 = arith.addf %107, %109 : vector<8x128xf32>
    %111 = math.tanh %110 : vector<8x128xf32>
    %112 = vector.extract_strided_slice %111 {offsets = [0, 0], sizes = [8, 32], strides = [1, 1]} : vector<8x128xf32> to vector<8x32xf32>
    %cst_39 = arith.constant 5.000000e-01 : f32
    %113 = vector.broadcast %cst_39 : f32 to vector<8x32xf32>
    %114 = arith.mulf %113, %112 : vector<8x32xf32>
    %cst_40 = arith.constant 5.000000e-01 : f32
    %115 = vector.broadcast %cst_40 : f32 to vector<8x32xf32>
    %116 = arith.addf %114, %115 : vector<8x32xf32>
    %117 = vector.extract_strided_slice %111 {offsets = [0, 32], sizes = [8, 32], strides = [1, 1]} : vector<8x128xf32> to vector<8x32xf32>
    %cst_41 = arith.constant 5.000000e-01 : f32
    %118 = vector.broadcast %cst_41 : f32 to vector<8x32xf32>
    %119 = arith.mulf %118, %117 : vector<8x32xf32>
    %cst_42 = arith.constant 5.000000e-01 : f32
    %120 = vector.broadcast %cst_42 : f32 to vector<8x32xf32>
    %121 = arith.addf %119, %120 : vector<8x32xf32>
    %122 = vector.extract_strided_slice %111 {offsets = [0, 64], sizes = [8, 32], strides = [1, 1]} : vector<8x128xf32> to vector<8x32xf32>
    %123 = vector.extract_strided_slice %111 {offsets = [0, 96], sizes = [8, 32], strides = [1, 1]} : vector<8x128xf32> to vector<8x32xf32>
    %cst_43 = arith.constant 5.000000e-01 : f32
    %124 = vector.broadcast %cst_43 : f32 to vector<8x32xf32>
    %125 = arith.mulf %124, %123 : vector<8x32xf32>
    %cst_44 = arith.constant 5.000000e-01 : f32
    %126 = vector.broadcast %cst_44 : f32 to vector<8x32xf32>
    %127 = arith.addf %125, %126 : vector<8x32xf32>
    %128 = arith.mulf %121, %104 : vector<8x32xf32>
    %129 = arith.mulf %116, %122 : vector<8x32xf32>
    %130 = arith.addf %128, %129 : vector<8x32xf32>
    %131 = math.tanh %130 : vector<8x32xf32>
    %132 = arith.mulf %127, %131 : vector<8x32xf32>
    %c40 = arith.constant 40 : index
    %c0_45 = arith.constant 0 : index
    %133 = vector.load %arg0[%c40, %c0_45] : memref<64x128xf32, #tpu.memory_space<vmem>>, vector<8x128xf32>
    %134 = arith.truncf %132 : vector<8x32xf32> to vector<8x32xbf16>
    %cst_46 = arith.constant dense<0.000000e+00> : vector<8x128xf32>
    %135 = tpu.matmul %134, %0, %cst_46 {dimension_numbers = #tpu.dot_dimension_numbers<[1], [0], [0], [1], [0, 0, 1, 1], [], []>} : vector<8x32xbf16>, vector<32x128xbf16>, vector<8x128xf32> -> vector<8x128xf32>
    %136 = arith.addf %133, %135 : vector<8x128xf32>
    %137 = math.tanh %136 : vector<8x128xf32>
    %138 = vector.extract_strided_slice %137 {offsets = [0, 0], sizes = [8, 32], strides = [1, 1]} : vector<8x128xf32> to vector<8x32xf32>
    %cst_47 = arith.constant 5.000000e-01 : f32
    %139 = vector.broadcast %cst_47 : f32 to vector<8x32xf32>
    %140 = arith.mulf %139, %138 : vector<8x32xf32>
    %cst_48 = arith.constant 5.000000e-01 : f32
    %141 = vector.broadcast %cst_48 : f32 to vector<8x32xf32>
    %142 = arith.addf %140, %141 : vector<8x32xf32>
    %143 = vector.extract_strided_slice %137 {offsets = [0, 32], sizes = [8, 32], strides = [1, 1]} : vector<8x128xf32> to vector<8x32xf32>
    %cst_49 = arith.constant 5.000000e-01 : f32
    %144 = vector.broadcast %cst_49 : f32 to vector<8x32xf32>
    %145 = arith.mulf %144, %143 : vector<8x32xf32>
    %cst_50 = arith.constant 5.000000e-01 : f32
    %146 = vector.broadcast %cst_50 : f32 to vector<8x32xf32>
    %147 = arith.addf %145, %146 : vector<8x32xf32>
    %148 = vector.extract_strided_slice %137 {offsets = [0, 64], sizes = [8, 32], strides = [1, 1]} : vector<8x128xf32> to vector<8x32xf32>
    %149 = vector.extract_strided_slice %137 {offsets = [0, 96], sizes = [8, 32], strides = [1, 1]} : vector<8x128xf32> to vector<8x32xf32>
    %cst_51 = arith.constant 5.000000e-01 : f32
    %150 = vector.broadcast %cst_51 : f32 to vector<8x32xf32>
    %151 = arith.mulf %150, %149 : vector<8x32xf32>
    %cst_52 = arith.constant 5.000000e-01 : f32
    %152 = vector.broadcast %cst_52 : f32 to vector<8x32xf32>
    %153 = arith.addf %151, %152 : vector<8x32xf32>
    %154 = arith.mulf %147, %130 : vector<8x32xf32>
    %155 = arith.mulf %142, %148 : vector<8x32xf32>
    %156 = arith.addf %154, %155 : vector<8x32xf32>
    %157 = math.tanh %156 : vector<8x32xf32>
    %158 = arith.mulf %153, %157 : vector<8x32xf32>
    %c48 = arith.constant 48 : index
    %c0_53 = arith.constant 0 : index
    %159 = vector.load %arg0[%c48, %c0_53] : memref<64x128xf32, #tpu.memory_space<vmem>>, vector<8x128xf32>
    %160 = arith.truncf %158 : vector<8x32xf32> to vector<8x32xbf16>
    %cst_54 = arith.constant dense<0.000000e+00> : vector<8x128xf32>
    %161 = tpu.matmul %160, %0, %cst_54 {dimension_numbers = #tpu.dot_dimension_numbers<[1], [0], [0], [1], [0, 0, 1, 1], [], []>} : vector<8x32xbf16>, vector<32x128xbf16>, vector<8x128xf32> -> vector<8x128xf32>
    %162 = arith.addf %159, %161 : vector<8x128xf32>
    %163 = math.tanh %162 : vector<8x128xf32>
    %164 = vector.extract_strided_slice %163 {offsets = [0, 0], sizes = [8, 32], strides = [1, 1]} : vector<8x128xf32> to vector<8x32xf32>
    %cst_55 = arith.constant 5.000000e-01 : f32
    %165 = vector.broadcast %cst_55 : f32 to vector<8x32xf32>
    %166 = arith.mulf %165, %164 : vector<8x32xf32>
    %cst_56 = arith.constant 5.000000e-01 : f32
    %167 = vector.broadcast %cst_56 : f32 to vector<8x32xf32>
    %168 = arith.addf %166, %167 : vector<8x32xf32>
    %169 = vector.extract_strided_slice %163 {offsets = [0, 32], sizes = [8, 32], strides = [1, 1]} : vector<8x128xf32> to vector<8x32xf32>
    %cst_57 = arith.constant 5.000000e-01 : f32
    %170 = vector.broadcast %cst_57 : f32 to vector<8x32xf32>
    %171 = arith.mulf %170, %169 : vector<8x32xf32>
    %cst_58 = arith.constant 5.000000e-01 : f32
    %172 = vector.broadcast %cst_58 : f32 to vector<8x32xf32>
    %173 = arith.addf %171, %172 : vector<8x32xf32>
    %174 = vector.extract_strided_slice %163 {offsets = [0, 64], sizes = [8, 32], strides = [1, 1]} : vector<8x128xf32> to vector<8x32xf32>
    %175 = vector.extract_strided_slice %163 {offsets = [0, 96], sizes = [8, 32], strides = [1, 1]} : vector<8x128xf32> to vector<8x32xf32>
    %cst_59 = arith.constant 5.000000e-01 : f32
    %176 = vector.broadcast %cst_59 : f32 to vector<8x32xf32>
    %177 = arith.mulf %176, %175 : vector<8x32xf32>
    %cst_60 = arith.constant 5.000000e-01 : f32
    %178 = vector.broadcast %cst_60 : f32 to vector<8x32xf32>
    %179 = arith.addf %177, %178 : vector<8x32xf32>
    %180 = arith.mulf %173, %156 : vector<8x32xf32>
    %181 = arith.mulf %168, %174 : vector<8x32xf32>
    %182 = arith.addf %180, %181 : vector<8x32xf32>
    %183 = math.tanh %182 : vector<8x32xf32>
    %184 = arith.mulf %179, %183 : vector<8x32xf32>
    %c56 = arith.constant 56 : index
    %c0_61 = arith.constant 0 : index
    %185 = vector.load %arg0[%c56, %c0_61] : memref<64x128xf32, #tpu.memory_space<vmem>>, vector<8x128xf32>
    %186 = arith.truncf %184 : vector<8x32xf32> to vector<8x32xbf16>
    %cst_62 = arith.constant dense<0.000000e+00> : vector<8x128xf32>
    %187 = tpu.matmul %186, %0, %cst_62 {dimension_numbers = #tpu.dot_dimension_numbers<[1], [0], [0], [1], [0, 0, 1, 1], [], []>} : vector<8x32xbf16>, vector<32x128xbf16>, vector<8x128xf32> -> vector<8x128xf32>
    %188 = arith.addf %185, %187 : vector<8x128xf32>
    %189 = math.tanh %188 : vector<8x128xf32>
    %190 = vector.extract_strided_slice %189 {offsets = [0, 0], sizes = [8, 32], strides = [1, 1]} : vector<8x128xf32> to vector<8x32xf32>
    %cst_63 = arith.constant 5.000000e-01 : f32
    %191 = vector.broadcast %cst_63 : f32 to vector<8x32xf32>
    %192 = arith.mulf %191, %190 : vector<8x32xf32>
    %cst_64 = arith.constant 5.000000e-01 : f32
    %193 = vector.broadcast %cst_64 : f32 to vector<8x32xf32>
    %194 = arith.addf %192, %193 : vector<8x32xf32>
    %195 = vector.extract_strided_slice %189 {offsets = [0, 32], sizes = [8, 32], strides = [1, 1]} : vector<8x128xf32> to vector<8x32xf32>
    %cst_65 = arith.constant 5.000000e-01 : f32
    %196 = vector.broadcast %cst_65 : f32 to vector<8x32xf32>
    %197 = arith.mulf %196, %195 : vector<8x32xf32>
    %cst_66 = arith.constant 5.000000e-01 : f32
    %198 = vector.broadcast %cst_66 : f32 to vector<8x32xf32>
    %199 = arith.addf %197, %198 : vector<8x32xf32>
    %200 = vector.extract_strided_slice %189 {offsets = [0, 64], sizes = [8, 32], strides = [1, 1]} : vector<8x128xf32> to vector<8x32xf32>
    %201 = vector.extract_strided_slice %189 {offsets = [0, 96], sizes = [8, 32], strides = [1, 1]} : vector<8x128xf32> to vector<8x32xf32>
    %cst_67 = arith.constant 5.000000e-01 : f32
    %202 = vector.broadcast %cst_67 : f32 to vector<8x32xf32>
    %203 = arith.mulf %202, %201 : vector<8x32xf32>
    %cst_68 = arith.constant 5.000000e-01 : f32
    %204 = vector.broadcast %cst_68 : f32 to vector<8x32xf32>
    %205 = arith.addf %203, %204 : vector<8x32xf32>
    %206 = arith.mulf %199, %182 : vector<8x32xf32>
    %207 = arith.mulf %194, %200 : vector<8x32xf32>
    %208 = arith.addf %206, %207 : vector<8x32xf32>
    %209 = math.tanh %208 : vector<8x32xf32>
    %210 = arith.mulf %205, %209 : vector<8x32xf32>
    %c0_69 = arith.constant 0 : index
    %c0_70 = arith.constant 0 : index
    %211 = vector.load %arg4[%c0_69, %c0_70] : memref<8x256xf32, #tpu.memory_space<vmem>>, vector<8x32xf32>
    tpu.vector_store %arg4[%c0_69, %c0_70], %28 {strides = array<i32>} : memref<8x256xf32, #tpu.memory_space<vmem>>, vector<8x32xf32>,
    %c0_71 = arith.constant 0 : index
    %c32_72 = arith.constant 32 : index
    %212 = vector.load %arg4[%c0_71, %c32_72] : memref<8x256xf32, #tpu.memory_space<vmem>>, vector<8x32xf32>
    tpu.vector_store %arg4[%c0_71, %c32_72], %54 {strides = array<i32>} : memref<8x256xf32, #tpu.memory_space<vmem>>, vector<8x32xf32>,
    %c0_73 = arith.constant 0 : index
    %c64 = arith.constant 64 : index
    %213 = vector.load %arg4[%c0_73, %c64] : memref<8x256xf32, #tpu.memory_space<vmem>>, vector<8x32xf32>
    tpu.vector_store %arg4[%c0_73, %c64], %80 {strides = array<i32>} : memref<8x256xf32, #tpu.memory_space<vmem>>, vector<8x32xf32>,
    %c0_74 = arith.constant 0 : index
    %c96 = arith.constant 96 : index
    %214 = vector.load %arg4[%c0_74, %c96] : memref<8x256xf32, #tpu.memory_space<vmem>>, vector<8x32xf32>
    tpu.vector_store %arg4[%c0_74, %c96], %106 {strides = array<i32>} : memref<8x256xf32, #tpu.memory_space<vmem>>, vector<8x32xf32>,
    %c0_75 = arith.constant 0 : index
    %c128 = arith.constant 128 : index
    %215 = vector.load %arg4[%c0_75, %c128] : memref<8x256xf32, #tpu.memory_space<vmem>>, vector<8x32xf32>
    tpu.vector_store %arg4[%c0_75, %c128], %132 {strides = array<i32>} : memref<8x256xf32, #tpu.memory_space<vmem>>, vector<8x32xf32>,
    %c0_76 = arith.constant 0 : index
    %c160 = arith.constant 160 : index
    %216 = vector.load %arg4[%c0_76, %c160] : memref<8x256xf32, #tpu.memory_space<vmem>>, vector<8x32xf32>
    tpu.vector_store %arg4[%c0_76, %c160], %158 {strides = array<i32>} : memref<8x256xf32, #tpu.memory_space<vmem>>, vector<8x32xf32>,
    %c0_77 = arith.constant 0 : index
    %c192 = arith.constant 192 : index
    %217 = vector.load %arg4[%c0_77, %c192] : memref<8x256xf32, #tpu.memory_space<vmem>>, vector<8x32xf32>
    tpu.vector_store %arg4[%c0_77, %c192], %184 {strides = array<i32>} : memref<8x256xf32, #tpu.memory_space<vmem>>, vector<8x32xf32>,
    %c0_78 = arith.constant 0 : index
    %c224 = arith.constant 224 : index
    %218 = vector.load %arg4[%c0_78, %c224] : memref<8x256xf32, #tpu.memory_space<vmem>>, vector<8x32xf32>
    tpu.vector_store %arg4[%c0_78, %c224], %210 {strides = array<i32>} : memref<8x256xf32, #tpu.memory_space<vmem>>, vector<8x32xf32>,
    %c0_79 = arith.constant 0 : index
    %c0_80 = arith.constant 0 : index
    %219 = vector.load %arg5[%c0_79, %c0_80] : memref<8x32xf32, #tpu.memory_space<vmem>>, vector<8x32xf32>
    tpu.vector_store %arg5[%c0_79, %c0_80], %208 {strides = array<i32>} : memref<8x32xf32, #tpu.memory_space<vmem>>, vector<8x32xf32>,
    return
  }
}

</mosaic_0001>

<bundles_post_ra>
// kernel: lstm_model_climate_forward.1
= control target key start
LH: loop header
LB: loop body
LE: loop exit
PB: predicated region body
PF: predicated region fallthrough
CT: control target
= control target key end

     0   :  { %v777_v0 = vmov 0.0   ;;  %vm778_vm0 = vmmov 0   ;;  %vm40_vm1 = vcmask 261120   ;;  %s779_s24 = smov 64   ;;  %s780_s27 = smov 32   ;;  %vm601_vm2 = vcmask 523520   ;;  %s999_s3 = inlined_call_operand.vmem [shape: bf16[32,128], index: 3, kind: input, shape index: {}]   ;;  %s1000_s1 = inlined_call_operand.vmem [shape: f32[8,32], index: 1, kind: input, shape index: {}]   ;;  %s1001_s0 = inlined_call_operand.vmem [shape: f32[64,128], index: 0, kind: input, shape index: {}]   ;;  %s1002_s2 = inlined_call_operand.vmem [shape: f32[8,32], index: 2, kind: input, shape index: {}]   ;;  %s1003_s4 = inlined_call_operand.vmem [shape: f32[8,256], index: 4, kind: output, shape index: {0}]   ;;  %s1004_s5 = inlined_call_operand.vmem [shape: f32[8,32], index: 5, kind: output, shape index: {1}]  }
   0x1   :  { %674 = vmatprep.subr.bf16.mxu0 %v777_v0  ;;  %v816_v1 = vld [vmem:[%s999_s3 + $0x8] sm:$0xff]   ;;  %678 = vmatprep.mubr.msk.bf16.mxu0 %vm778_vm0, %v777_v0  ;;  %v827_v2 = vld [vmem:[%s999_s3] sm:$0xff]   ;;  %v178_v45 = vld [vmem:[%s1001_s0 + $0x10] sm:$0xff]  ;;  %s781_s17 = smov 96   ;;  %vm607_vm3 = vcmask 785920   ;;  %vm609_vm4 = vcmask 1048320  }
   0x2   :  { %682 = vmatprep.subr.bf16.mxu1 %v777_v0  ;;  %686 = vmatprep.mubr.msk.bf16.mxu1 %vm778_vm0, %v777_v0  ;;  %v24_v3 = vld [vmem:[%s1000_s1] sm:$0xff]  ;;  %v109_v26 = vld [vmem:[%s1001_s0 + $0x8] sm:$0xff] }
   0x3   :  { %675 = vmatpush3.bf16.msra.mxu0 %v816_v1  ;;  %683 = vmatpush3.bf16.msra.mxu1 %v816_v1  ;;  %v27_v4 = vpack.c.bf16 %v24_v3, %v24_v3  ;;  %v26_v5 = vld [vmem:[%s1001_s0] sm:$0xff]  ;;  %v247_v3 = vld [vmem:[%s1001_s0 + $0x18] sm:$0xff] }
   0x4   :  { %676 = vmatprep.subr.bf16.mxu0 %v777_v0  ;;  %684 = vmatprep.subr.bf16.mxu1 %v777_v0  ;;  %v25_v12 = vld [vmem:[%s1002_s2] sm:$0xff] }
   0x7   :  { %677 = vmatpush3.bf16.msra.mxu0 %v827_v2  ;;  %685 = vmatpush3.bf16.msra.mxu1 %v827_v2 }
   0x8   :  { %690 = vmatprep.subr.bf16.mxu0 %v777_v0  ;;  %698 = vmatprep.subr.bf16.mxu1 %v777_v0 }
   0xa   :  { %679 = vmatmul.mubr.msk.bf16.vlgmr.msra.gmra.mxu0 %vm40_vm1, %v27_v4 }
   0xb   :  { %691 = vmatpush3.bf16.msra.mxu0 %v816_v1  ;;  %694 = vmatprep.mubr.msk.bf16.mxu0 %vm778_vm0, %v777_v0 }
   0xc   :  { %692 = vmatprep.subr.bf16.mxu0 %v777_v0 }
   0xf   :  { %693 = vmatpush3.bf16.msra.mxu0 %v827_v2 }
  0x10   :  { %706 = vmatprep.subr.bf16.mxu0 %v777_v0 }
  0xca   :  { %v78_v6 = vpop.f32.mrf.mxu0 }
  0xcb   :  { %v84_v7 = vadd.f32 %v78_v6, %v26_v5 }
  0xcc   :  { %v680_v8 = vpop.f32.mrf.mxu0 }
  0xcd   :  { %745 = vtanh.f32 %v84_v7 }
  0xce   :  { %v81_v9 = vpop.f32.mrf.mxu0 }
  0xd0   :  { %v681_v10 = vpop.f32.mrf.mxu0 }
  0xda   :  { %v746_v11 = vpop.eup %745 }
  0xdb   :  { %94 = vrot.lane.b32.xlu0 %v746_v11, %s779_s24  ;;  %v86_v13 = vmul.f32 0.5, %v746_v11 }
  0xdd   :  { %v87_v14 = vadd.f32 0.5, %v86_v13 }
  0xdf   :  { %89 = vrot.lane.b32.xlu0 %v25_v12, %s780_s27 }
 0x14d   :  { %v95_v15 = vpop.permute.xlu0 %94 }
 0x14e   :  { %v97_v16 = vmul.f32 %v95_v15, %v87_v14 }
 0x150   :  { %99 = vrot.lane.b32.xlu1 %v97_v16, %s780_s27 }
 0x151   :  { %v90_v17 = vpop.permute.xlu0 %89 }
 0x152   :  { %v92_v18 = vmul.f32 %v90_v17, %v87_v14 }
 0x1c2   :  { %v100_v19 = vpop.permute.xlu1 %99 }
 0x1c3   :  { %v102_v20 = vadd.f32 %v100_v19, %v92_v18 }
 0x1c5   :  { %747 = vtanh.f32 %v102_v20 }
 0x1d2   :  { %v748_v21 = vpop.eup %747 }
 0x1d3   :  { %105 = vrot.lane.b32.xlu1 %v748_v21, %s779_s24 }
 0x245   :  { %v106_v22 = vpop.permute.xlu1 %105 }
 0x246   :  { %v856_v23 = vmul.f32 %v106_v22, %v87_v14  ;;  %v316_v22 = vld [vmem:[%s1001_s0 + $0x20] sm:$0xff] }
 0x248   :  { %v110_v24 = vpack.c.bf16 %v856_v23, %v856_v23 }
 0x24a   :  { %112 = vrot.lane.b32.xlu0 %v110_v24, %s780_s27 }
 0x2bc   :  { %v113_v25 = vpop.permute.xlu0 %112 }
 0x2bd   :  { %687 = vmatmul.mubr.msk.bf16.vlgmr.msra.gmra.mxu1 %vm40_vm1, %v113_v25 }
 0x2be   :  { %699 = vmatpush3.bf16.msra.mxu1 %v816_v1  ;;  %702 = vmatprep.mubr.msk.bf16.mxu1 %vm778_vm0, %v777_v0 }
 0x2bf   :  { %700 = vmatprep.subr.bf16.mxu1 %v777_v0 }
 0x2c2   :  { %701 = vmatpush3.bf16.msra.mxu1 %v827_v2 }
 0x2c3   :  { %714 = vmatprep.subr.bf16.mxu1 %v777_v0 }
 0x37d   :  { %v151_v27 = vpop.f32.mrf.mxu1 }
 0x37e   :  { %v157_v28 = vadd.f32 %v151_v27, %v109_v26 }
 0x37f   :  { %v688_v29 = vpop.f32.mrf.mxu1 }
 0x380   :  { %749 = vtanh.f32 %v157_v28 }
 0x381   :  { %v154_v30 = vpop.f32.mrf.mxu1 }
 0x383   :  { %v689_v31 = vpop.f32.mrf.mxu1 }
 0x38d   :  { %v750_v32 = vpop.eup %749 }
 0x38e   :  { %163 = vrot.lane.b32.xlu1 %v750_v32, %s779_s24  ;;  %v159_v33 = vmul.f32 0.5, %v750_v32 }
 0x390   :  { %v160_v34 = vadd.f32 0.5, %v159_v33 }
 0x392   :  { %v161_v37 = vmul.f32 %v160_v34, %v102_v20 }
 0x400   :  { %v164_v35 = vpop.permute.xlu1 %163 }
 0x401   :  { %v166_v36 = vmul.f32 %v164_v35, %v160_v34 }
 0x403   :  { %168 = vrot.lane.b32.xlu0 %v166_v36, %s780_s27 }
 0x475   :  { %v169_v38 = vpop.permute.xlu0 %168 }
 0x476   :  { %v171_v39 = vadd.f32 %v169_v38, %v161_v37 }
 0x478   :  { %751 = vtanh.f32 %v171_v39 }
 0x485   :  { %v752_v40 = vpop.eup %751 }
 0x486   :  { %174 = vrot.lane.b32.xlu1 %v752_v40, %s779_s24 }
 0x4f8   :  { %v175_v41 = vpop.permute.xlu1 %174 }
 0x4f9   :  { %v874_v42 = vmul.f32 %v175_v41, %v160_v34 }
 0x4fb   :  { %v179_v43 = vpack.c.bf16 %v874_v42, %v874_v42 }
 0x4fd   :  { %181 = vrot.lane.b32.xlu0 %v179_v43, %s780_s27  ;;  %v385_v43 = vld [vmem:[%s1001_s0 + $0x28] sm:$0xff] }
 0x56f   :  { %v182_v44 = vpop.permute.xlu0 %181 }
 0x570   :  { %695 = vmatmul.mubr.msk.bf16.vlgmr.msra.gmra.mxu0 %vm40_vm1, %v182_v44 }
 0x571   :  { %707 = vmatpush3.bf16.msra.mxu0 %v816_v1  ;;  %710 = vmatprep.mubr.msk.bf16.mxu0 %vm778_vm0, %v777_v0 }
 0x572   :  { %708 = vmatprep.subr.bf16.mxu0 %v777_v0 }
 0x575   :  { %709 = vmatpush3.bf16.msra.mxu0 %v827_v2 }
 0x576   :  { %722 = vmatprep.subr.bf16.mxu0 %v777_v0 }
 0x630   :  { %v220_v46 = vpop.f32.mrf.mxu0 }
 0x631   :  { %v226_v47 = vadd.f32 %v220_v46, %v178_v45 }
 0x632   :  { %v696_v48 = vpop.f32.mrf.mxu0 }
 0x633   :  { %753 = vtanh.f32 %v226_v47 }
 0x634   :  { %v223_v49 = vpop.f32.mrf.mxu0 }
 0x636   :  { %v697_v50 = vpop.f32.mrf.mxu0 }
 0x640   :  { %v754_v51 = vpop.eup %753 }
 0x641   :  { %232 = vrot.lane.b32.xlu1 %v754_v51, %s779_s24  ;;  %v228_v52 = vmul.f32 0.5, %v754_v51 }
 0x643   :  { %v229_v53 = vadd.f32 0.5, %v228_v52 }
 0x645   :  { %v230_v56 = vmul.f32 %v229_v53, %v171_v39 }
 0x6b3   :  { %v233_v54 = vpop.permute.xlu1 %232 }
 0x6b4   :  { %v235_v55 = vmul.f32 %v233_v54, %v229_v53 }
 0x6b6   :  { %237 = vrot.lane.b32.xlu0 %v235_v55, %s780_s27 }
 0x728   :  { %v238_v57 = vpop.permute.xlu0 %237 }
 0x729   :  { %v240_v58 = vadd.f32 %v238_v57, %v230_v56 }
 0x72b   :  { %755 = vtanh.f32 %v240_v58 }
 0x738   :  { %v756_v59 = vpop.eup %755 }
 0x739   :  { %243 = vrot.lane.b32.xlu1 %v756_v59, %s779_s24  ;;  %v454_v59 = vld [vmem:[%s1001_s0 + $0x30] sm:$0xff] }
 0x7ab   :  { %v244_v60 = vpop.permute.xlu1 %243 }
 0x7ac   :  { %v892_v61 = vmul.f32 %v244_v60, %v229_v53 }
 0x7ae   :  { %v248_v62 = vpack.c.bf16 %v892_v61, %v892_v61 }
 0x7b0   :  { %250 = vrot.lane.b32.xlu0 %v248_v62, %s780_s27 }
 0x822   :  { %v251_v63 = vpop.permute.xlu0 %250 }
 0x823   :  { %703 = vmatmul.mubr.msk.bf16.vlgmr.msra.gmra.mxu1 %vm40_vm1, %v251_v63 }
 0x824   :  { %715 = vmatpush3.bf16.msra.mxu1 %v816_v1  ;;  %718 = vmatprep.mubr.msk.bf16.mxu1 %vm778_vm0, %v777_v0 }
 0x825   :  { %716 = vmatprep.subr.bf16.mxu1 %v777_v0 }
 0x828   :  { %717 = vmatpush3.bf16.msra.mxu1 %v827_v2 }
 0x829   :  { %730 = vmatprep.subr.bf16.mxu1 %v777_v0 }
 0x8e3   :  { %v289_v4 = vpop.f32.mrf.mxu1 }
 0x8e4   :  { %v295_v5 = vadd.f32 %v289_v4, %v247_v3 }
 0x8e5   :  { %v704_v6 = vpop.f32.mrf.mxu1 }
 0x8e6   :  { %757 = vtanh.f32 %v295_v5 }
 0x8e7   :  { %v292_v7 = vpop.f32.mrf.mxu1 }
 0x8e9   :  { %v705_v8 = vpop.f32.mrf.mxu1 }
 0x8f3   :  { %v758_v9 = vpop.eup %757 }
 0x8f4   :  { %301 = vrot.lane.b32.xlu1 %v758_v9, %s779_s24  ;;  %v297_v10 = vmul.f32 0.5, %v758_v9 }
 0x8f6   :  { %v298_v11 = vadd.f32 0.5, %v297_v10 }
 0x8f8   :  { %v299_v14 = vmul.f32 %v298_v11, %v240_v58 }
 0x966   :  { %v302_v12 = vpop.permute.xlu1 %301 }
 0x967   :  { %v304_v13 = vmul.f32 %v302_v12, %v298_v11 }
 0x969   :  { %306 = vrot.lane.b32.xlu0 %v304_v13, %s780_s27 }
 0x9db   :  { %v307_v15 = vpop.permute.xlu0 %306 }
 0x9dc   :  { %v309_v16 = vadd.f32 %v307_v15, %v299_v14 }
 0x9de   :  { %759 = vtanh.f32 %v309_v16 }
 0x9eb   :  { %v760_v17 = vpop.eup %759 }
 0x9ec   :  { %312 = vrot.lane.b32.xlu1 %v760_v17, %s779_s24 }
 0xa5e   :  { %v313_v18 = vpop.permute.xlu1 %312 }
 0xa5f   :  { %v910_v19 = vmul.f32 %v313_v18, %v298_v11  ;;  %v523_v18 = vld [vmem:[%s1001_s0 + $0x38] sm:$0xff] }
 0xa61   :  { %v317_v20 = vpack.c.bf16 %v910_v19, %v910_v19 }
 0xa63   :  { %319 = vrot.lane.b32.xlu0 %v317_v20, %s780_s27 }
 0xad5   :  { %v320_v21 = vpop.permute.xlu0 %319 }
 0xad6   :  { %711 = vmatmul.mubr.msk.bf16.vlgmr.msra.gmra.mxu0 %vm40_vm1, %v320_v21 }
 0xad7   :  { %723 = vmatpush3.bf16.msra.mxu0 %v816_v1  ;;  %726 = vmatprep.mubr.msk.bf16.mxu0 %vm778_vm0, %v777_v0 }
 0xad8   :  { %724 = vmatprep.subr.bf16.mxu0 %v777_v0 }
 0xadb   :  { %725 = vmatpush3.bf16.msra.mxu0 %v827_v2 }
 0xb96   :  { %v358_v24 = vpop.f32.mrf.mxu0 }
 0xb97   :  { %v364_v25 = vadd.f32 %v358_v24, %v316_v22 }
 0xb98   :  { %v712_v26 = vpop.f32.mrf.mxu0 }
 0xb99   :  { %761 = vtanh.f32 %v364_v25 }
 0xb9a   :  { %v361_v27 = vpop.f32.mrf.mxu0 }
 0xb9c   :  { %v713_v28 = vpop.f32.mrf.mxu0 }
 0xba6   :  { %v762_v29 = vpop.eup %761 }
 0xba7   :  { %370 = vrot.lane.b32.xlu1 %v762_v29, %s779_s24  ;;  %v366_v30 = vmul.f32 0.5, %v762_v29 }
 0xba9   :  { %v367_v31 = vadd.f32 0.5, %v366_v30 }
 0xbab   :  { %v368_v34 = vmul.f32 %v367_v31, %v309_v16 }
 0xc19   :  { %v371_v32 = vpop.permute.xlu1 %370 }
 0xc1a   :  { %v373_v33 = vmul.f32 %v371_v32, %v367_v31 }
 0xc1c   :  { %375 = vrot.lane.b32.xlu0 %v373_v33, %s780_s27 }
 0xc8e   :  { %v376_v35 = vpop.permute.xlu0 %375 }
 0xc8f   :  { %v378_v36 = vadd.f32 %v376_v35, %v368_v34 }
 0xc91   :  { %763 = vtanh.f32 %v378_v36 }
 0xc9e   :  { %v764_v37 = vpop.eup %763 }
 0xc9f   :  { %381 = vrot.lane.b32.xlu1 %v764_v37, %s779_s24 }
 0xd11   :  { %v382_v38 = vpop.permute.xlu1 %381 }
 0xd12   :  { %v927_v39 = vmul.f32 %v382_v38, %v367_v31 }
 0xd14   :  { %v386_v40 = vpack.c.bf16 %v927_v39, %v927_v39 }
 0xd16   :  { %388 = vrot.lane.b32.xlu0 %v386_v40, %s780_s27 }
 0xd88   :  { %v389_v41 = vpop.permute.xlu0 %388 }
 0xd89   :  { %719 = vmatmul.mubr.msk.bf16.vlgmr.msra.gmra.mxu1 %vm40_vm1, %v389_v41 }
 0xd8a   :  { %731 = vmatpush3.bf16.msra.mxu1 %v816_v1  ;;  %734 = vmatprep.mubr.msk.bf16.mxu1 %vm778_vm0, %v777_v0 }
 0xd8b   :  { %732 = vmatprep.subr.bf16.mxu1 %v777_v0 }
 0xd8e   :  { %733 = vmatpush3.bf16.msra.mxu1 %v827_v2 }
 0xe49   :  { %v427_v44 = vpop.f32.mrf.mxu1 }
 0xe4a   :  { %v433_v45 = vadd.f32 %v427_v44, %v385_v43 }
 0xe4b   :  { %v720_v46 = vpop.f32.mrf.mxu1 }
 0xe4c   :  { %765 = vtanh.f32 %v433_v45 }
 0xe4d   :  { %v430_v47 = vpop.f32.mrf.mxu1 }
 0xe4f   :  { %v721_v48 = vpop.f32.mrf.mxu1 }
 0xe59   :  { %v766_v49 = vpop.eup %765 }
 0xe5a   :  { %439 = vrot.lane.b32.xlu1 %v766_v49, %s779_s24  ;;  %v435_v1 = vmul.f32 0.5, %v766_v49 }
 0xe5c   :  { %v436_v50 = vadd.f32 0.5, %v435_v1 }
 0xe5e   :  { %v437_v0 = vmul.f32 %v436_v50, %v378_v36 }
 0xecc   :  { %v440_v51 = vpop.permute.xlu1 %439 }
 0xecd   :  { %v442_v52 = vmul.f32 %v440_v51, %v436_v50 }
 0xecf   :  { %444 = vrot.lane.b32.xlu0 %v442_v52, %s780_s27 }
 0xf41   :  { %v445_v2 = vpop.permute.xlu0 %444 }
 0xf42   :  { %v447_v53 = vadd.f32 %v445_v2, %v437_v0 }
 0xf44   :  { %767 = vtanh.f32 %v447_v53 }
 0xf51   :  { %v768_v54 = vpop.eup %767 }
 0xf52   :  { %450 = vrot.lane.b32.xlu1 %v768_v54, %s779_s24 }
 0xfc4   :  { %v451_v55 = vpop.permute.xlu1 %450 }
 0xfc5   :  { %v453_v56 = vmul.f32 %v451_v55, %v436_v50 }
 0xfc7   :  { %v455_v57 = vpack.c.bf16 %v453_v56, %v453_v56 }
 0xfc9   :  { %457 = vrot.lane.b32.xlu0 %v455_v57, %s780_s27 }
0x103b   :  { %v458_v58 = vpop.permute.xlu0 %457 }
0x103c   :  { %727 = vmatmul.mubr.msk.bf16.vlgmr.msra.gmra.mxu0 %vm40_vm1, %v458_v58 }
0x10fc   :  { %v496_v60 = vpop.f32.mrf.mxu0 }
0x10fd   :  { %v502_v62 = vadd.f32 %v496_v60, %v454_v59 }
0x10fe   :  { %v728_v63 = vpop.f32.mrf.mxu0 }
0x10ff   :  { %769 = vtanh.f32 %v502_v62 }
0x1100   :  { %v499_v3 = vpop.f32.mrf.mxu0 }
0x1102   :  { %v729_v4 = vpop.f32.mrf.mxu0 }
0x110c   :  { %v770_v5 = vpop.eup %769 }
0x110d   :  { %508 = vrot.lane.b32.xlu1 %v770_v5, %s779_s24  ;;  %v504_v6 = vmul.f32 0.5, %v770_v5 }
0x110f   :  { %v505_v7 = vadd.f32 0.5, %v504_v6 }
0x1111   :  { %v506_v10 = vmul.f32 %v505_v7, %v447_v53 }
0x117f   :  { %v509_v8 = vpop.permute.xlu1 %508 }
0x1180   :  { %v511_v9 = vmul.f32 %v509_v8, %v505_v7 }
0x1182   :  { %513 = vrot.lane.b32.xlu0 %v511_v9, %s780_s27 }
0x11f4   :  { %v514_v11 = vpop.permute.xlu0 %513 }
0x11f5   :  { %v516_v12 = vadd.f32 %v514_v11, %v506_v10 }
0x11f7   :  { %771 = vtanh.f32 %v516_v12 }
0x1204   :  { %v772_v13 = vpop.eup %771 }
0x1205   :  { %519 = vrot.lane.b32.xlu1 %v772_v13, %s779_s24 }
0x1277   :  { %v520_v14 = vpop.permute.xlu1 %519 }
0x1278   :  { %v522_v15 = vmul.f32 %v520_v14, %v505_v7 }
0x127a   :  { %v524_v16 = vpack.c.bf16 %v522_v15, %v522_v15 }
0x127c   :  { %526 = vrot.lane.b32.xlu0 %v524_v16, %s780_s27 }
0x12ee   :  { %v527_v17 = vpop.permute.xlu0 %526 }
0x12ef   :  { %735 = vmatmul.mubr.msk.bf16.vlgmr.msra.gmra.mxu1 %vm40_vm1, %v527_v17 }
0x13af   :  { %v565_v20 = vpop.f32.mrf.mxu1 }
0x13b0   :  { %v571_v21 = vadd.f32 %v565_v20, %v523_v18 }
0x13b1   :  { %v736_v22 = vpop.f32.mrf.mxu1 }
0x13b2   :  { %773 = vtanh.f32 %v571_v21 }
0x13b3   :  { %v568_v24 = vpop.f32.mrf.mxu1 }
0x13b5   :  { %v737_v25 = vpop.f32.mrf.mxu1 }
0x13bf   :  { %v774_v26 = vpop.eup %773 }
0x13c0   :  { %577 = vrot.lane.b32.xlu1 %v774_v26, %s779_s24  ;;  %v573_v27 = vmul.f32 0.5, %v774_v26 }
0x13c2   :  { %v574_v28 = vadd.f32 0.5, %v573_v27 }
0x13c4   :  { %593 = vrot.lane.b32.xlu1 %v856_v23, %s780_s27  ;;  %v575_v23 = vmul.f32 %v574_v28, %v516_v12 }
0x13c8   :  { %617 = vrot.lane.b32.xlu1 %v453_v56, %s779_s24 }
0x1432   :  { %v578_v29 = vpop.permute.xlu1 %577 }
0x1433   :  { %v580_v30 = vmul.f32 %v578_v29, %v574_v28 }
0x1435   :  { %582 = vrot.lane.b32.xlu0 %v580_v30, %s780_s27 }
0x1436   :  { %v594_v31 = vpop.permute.xlu1 %593 }
0x1437   :  { %596 = vst.msk [vmem:[%s1003_s4] sm:$0xff] %vm40_vm1, %v594_v31 }
0x1439   :  { %612 = vrot.lane.b32.xlu0 %v927_v39, %s780_s27 }
0x143a   :  { %v618_v35 = vpop.permute.xlu1 %617 }
0x143d   :  { %598 = vrot.lane.b32.xlu0 %v874_v42, %s779_s24 }
0x1441   :  { %604 = vrot.lane.b32.xlu0 %v892_v61, %s781_s17 }
0x14a7   :  { %v583_v32 = vpop.permute.xlu0 %582 }
0x14a8   :  { %v585_v33 = vadd.f32 %v583_v32, %v575_v23 }
0x14aa   :  { %775 = vtanh.f32 %v585_v33  ;;  %628 = vrot.lane.b32.xlu0 %v585_v33, %s781_s17 }
0x14ab   :  { %v613_v34 = vpop.permute.xlu0 %612 }
0x14ac   :  { %615 = vst.msk [vmem:[%s1003_s4 + $0x8] sm:$0xff] %vm40_vm1, %v613_v34 }
0x14ad   :  { %620 = vst.msk [vmem:[%s1003_s4 + $0x8] sm:$0xff] %vm601_vm2, %v618_v35 }
0x14af   :  { %v599_v42 = vpop.permute.xlu0 %598 }
0x14b0   :  { %602 = vst.msk [vmem:[%s1003_s4] sm:$0xff] %vm601_vm2, %v599_v42 }
0x14b3   :  { %v605_v61 = vpop.permute.xlu0 %604 }
0x14b4   :  { %608 = vst.msk [vmem:[%s1003_s4] sm:$0xff] %vm607_vm3, %v605_v61 }
0x14b5   :  { %610 = vst.msk [vmem:[%s1003_s4] sm:$0xff] %vm609_vm4, %v910_v19 }
0x14b7   :  { %v776_v36 = vpop.eup %775 }
0x14b8   :  { %588 = vrot.lane.b32.xlu1 %v776_v36, %s779_s24 }
0x14bc   :  { %622 = vrot.lane.b32.xlu1 %v522_v15, %s781_s17 }
0x151c   :  { %v629_v37 = vpop.permute.xlu0 %628 }
0x151d   :  { %631 = vst.msk [vmem:[%s1004_s5] sm:$0xff] %vm40_vm1, %v629_v37 }
0x152a   :  { %v589_v38 = vpop.permute.xlu1 %588 }
0x152b   :  { %v591_v39 = vmul.f32 %v589_v38, %v574_v28 }
0x152e   :  { %v623_v40 = vpop.permute.xlu1 %622 }
0x152f   :  { %625 = vst.msk [vmem:[%s1003_s4 + $0x8] sm:$0xff] %vm607_vm3, %v623_v40 }
0x1530   :  { %626 = vst.msk [vmem:[%s1003_s4 + $0x8] sm:$0xff] %vm609_vm4, %v591_v39 }

</bundles_post_ra>
